<compile_context>
chip_gen: v7x
topology: tpu7x:2x2x1
jax: 0.10.0
libtpu: 0.0.40
codegen_flags: <defaults>
</compile_context>

<pallas_src>
import jax
import jax.numpy as jnp
from jax.experimental import pallas as pl
from jax.experimental.pallas import tpu as pltpu

LANE = 128


def _sigmoid_kernel(x_ref, o_ref):
    x = x_ref[...].astype(jnp.float32)
    # sigmoid(x) = 1 / (1 + exp(-x)); exp runs on the EUP. Exact reciprocal
    # (approx=False) keeps us within the 1e-5 tolerance; compute is hidden
    # behind DMA anyway for this HBM-bound kernel.
    o_ref[...] = pl.reciprocal(1.0 + jnp.exp(-x)).astype(o_ref.dtype)


def _round_up(x: int, m: int) -> int:
    return ((x + m - 1) // m) * m


def _min_sublane(dtype) -> int:
    itemsize = jnp.dtype(dtype).itemsize
    if itemsize >= 4:
        return 8
    if itemsize == 2:
        return 16
    return 32


def sigmoid_pallas(x: jax.Array) -> jax.Array:
    """Element-wise sigmoid as a Pallas TPU kernel (any-rank input)."""
    orig_shape = x.shape
    orig_dtype = x.dtype
    n = x.size
    if n == 0:
        return x

    sub = _min_sublane(orig_dtype)

    # Only pad when the flat size is not a multiple of the lane width (128).
    # For common NCHW activation tensors this branch is skipped, avoiding an
    # extra full-array HBM pass for jnp.pad and for the output slice.
    padded = (n % LANE) != 0
    x_flat = x.reshape(-1)
    if padded:
        n_pad = pl.cdiv(n, LANE) * LANE
        x_flat = jnp.pad(x_flat, (0, n_pad - n))
    else:
        n_pad = n
    rows = n_pad // LANE
    x2d = x_flat.reshape(rows, LANE)

    # Large fixed row tile (~2 MiB per f32 block) to amortize per-grid-step
    # overhead; the cdiv grid lets Pallas handle the partial edge block, so
    # no shrink-to-divide loop is needed.
    TARGET_ROWS = 4096
    row_tile = min(TARGET_ROWS, _round_up(rows, sub))
    # Prefer >= 2 grid steps when possible so v7x's two TensorCores both get
    # work on the "parallel" axis (no effect on single-TC v5e/v6e).
    if rows >= 2 * sub and pl.cdiv(rows, row_tile) < 2:
        row_tile = _round_up(pl.cdiv(rows, 2), sub)
    grid = (pl.cdiv(rows, row_tile),)

    out2d = pl.pallas_call(
        _sigmoid_kernel,
        out_shape=jax.ShapeDtypeStruct((rows, LANE), orig_dtype),
        grid_spec=pltpu.PrefetchScalarGridSpec(
            num_scalar_prefetch=0,
            grid=grid,
            in_specs=[pl.BlockSpec((row_tile, LANE), lambda i: (i, 0))],
            out_specs=pl.BlockSpec((row_tile, LANE), lambda i: (i, 0)),
        ),
        compiler_params=pltpu.CompilerParams(
            dimension_semantics=("parallel",),
            # Double-buffered in+out at 2 MiB blocks = ~8 MiB; raise the limit
            # so v5e's 16 MiB default scoped VMEM is never the constraint.
            vmem_limit_bytes=32 * 1024 * 1024,
        ),
    )(x2d)

    if padded:
        return out2d.reshape(-1)[:n].reshape(orig_shape)
    return out2d.reshape(orig_shape)


if __name__ == "__main__":
    key = jax.random.PRNGKey(0)
    # Small NCHW input, matching a typical conv-style layout: [B, C, H, W]
    x = jax.random.normal(key, (2, 4, 16, 16), dtype=jnp.float32)

    out = sigmoid_pallas(x)
    out = jax.block_until_ready(out)

    # Correctness check against plain JAX sigmoid.
    ref = jax.nn.sigmoid(x)
    assert out.shape == x.shape and out.dtype == x.dtype
    assert jnp.max(jnp.abs(out - ref)) < 1e-5

    print("KERNEL_OK")
</pallas_src>

<mosaic_0001>
module attributes {stable_mosaic.version = 11 : i64} {
  func.func @_sigmoid_kernel(%arg0: i32, %arg1: memref<8x128xf32, #tpu.memory_space<vmem>>, %arg2: memref<8x128xf32, #tpu.memory_space<vmem>>) attributes {dimension_semantics = [#tpu.dimension_semantics<parallel>], iteration_bounds = array<i64: 2>, scalar_prefetch = 0 : i64, scratch_operands = 0 : i64, tpu.core_type = #tpu.core_type<tc>, window_params = [{transform_indices = @transform_0, window_bounds = array<i64: 8, 128>}, {transform_indices = @transform_1, window_bounds = array<i64: 8, 128>}]} {
    %c0 = arith.constant 0 : index
    %c0_0 = arith.constant 0 : index
    %0 = vector.load %arg1[%c0, %c0_0] : memref<8x128xf32, #tpu.memory_space<vmem>>, vector<8x128xf32>
    %cst = arith.constant 0.000000e+00 : f32
    %1 = vector.broadcast %cst : f32 to vector<8x128xf32>
    %2 = arith.subf %1, %0 : vector<8x128xf32>
    %3 = math.exp %2 : vector<8x128xf32>
    %cst_1 = arith.constant 1.000000e+00 : f32
    %4 = vector.broadcast %cst_1 : f32 to vector<8x128xf32>
    %5 = arith.addf %4, %3 : vector<8x128xf32>
    %6 = tpu.reciprocal %5 : vector<8x128xf32> -> vector<8x128xf32>
    %c0_2 = arith.constant 0 : index
    %c0_3 = arith.constant 0 : index
    %7 = vector.load %arg2[%c0_2, %c0_3] : memref<8x128xf32, #tpu.memory_space<vmem>>, vector<8x128xf32>
    tpu.vector_store %arg2[%c0_2, %c0_3], %6 {strides = array<i32>} : memref<8x128xf32, #tpu.memory_space<vmem>>, vector<8x128xf32>,
    return
  }
  func.func @transform_0(%arg0: i32) -> (i32, i32) {
    %c0_i32 = arith.constant 0 : i32
    %c0_i32_0 = arith.constant 0 : i32
    return %arg0, %c0_i32 : i32, i32
  }
  func.func @transform_1(%arg0: i32) -> (i32, i32) {
    %c0_i32 = arith.constant 0 : i32
    %c0_i32_0 = arith.constant 0 : i32
    return %arg0, %c0_i32 : i32, i32
  }
}

</mosaic_0001>

<bundles_post_ra>
// kernel: tpu_custom_call.1
= control target key start
LH: loop header
LB: loop body
LE: loop exit
PB: predicated region body
PF: predicated region fallthrough
CT: control target
= control target key end

     0   :  { %6 = vsyncpa [#allocation3], 0  ;;  %s556_s0 = inlined_call_operand.hbm [shape: f32[16,128], index: 0, kind: input, shape index: {}]   ;;  %s557_s1 = inlined_call_operand.hbm [shape: f32[16,128], index: 1, kind: output, shape index: {}]  }
   0x1   :  { %8 = vsyncpa [#allocation3 + $0x1], 0 }
   0x2   :  { %9 = vsyncpa [#allocation4], 0 }
   0x3   :  { %11 = vsyncpa [#allocation4 + $0x1], 0  ;;  %s395_s6 = smov 0   ;;  %s397_s7 = smov 0  }
   0x4   :  { %s399_s8 = smov 0   ;;  %s401_s9 = smov 0  }
   0x5 LB: > { %s416_s10 = sadd.s32 4294967295, %s381_s9   ;;  %s223_s11 = sadd.s32 4294967294, %s381_s9   ;;  %s381_s9 = sphi %s401_s9, %s572_s9   ;;  %s377_s8 = sphi %s399_s8, %s571_s8   ;;  %s373_s7 = sphi %s397_s7, %s570_s7   ;;  %s369_s6 = sphi %s395_s6, %s569_s6  }
   0x6   : > { %s420_s12 = sadd.s32 1, %s381_s9   ;;  %s24_s13 = sadd.s32 1, %s377_s8 }
   0x7   : > { %s21_s14 = ssub.s32 %s381_s9, %s420_s12  ;;  %p31_p0 = scmp.ne.s32.totalorder %s377_s8, %s373_s7 }
   0x8   : > { %p22_p1 = scmp.eq.s32.totalorder %s21_s14, 0  ;;  %p32_p2 = scmp.eq.s32.totalorder %s381_s9, 0 }
   0x9   : > { %p37_p3 = scmp.ne.s32.totalorder %s373_s7, %s369_s6  ;;  %p38_p4 = scmp.eq.s32.totalorder %s416_s10, 0 }
   0xa   : > { %s432_s15 = scalar_select %p22_p1, %s377_s8, %s24_s13  }
   0xb   : > { %p434_p5 = por %p32_p2, %p31_p0  ;;  %p438_p6 = por %p38_p4, %p37_p3 }
   0xc   : > { %p61_p7 = scmp.eq.s32.totalorder %s416_s10, 1  ;;  %p67_p8 = scmp.eq.s32.totalorder %s223_s11, 1 }
   0xd   : > { %p247_p10 = scmp.lt.s32.totalorder %s381_s9, 2  ;;  %s87_s20 = sand.u32 1, %s377_s8  }
   0xe   : > { %p445_p11 = por %p61_p7, %p31_p0  ;;  %p449_p12 = por %p67_p8, %p37_p3 }
   0xf   : > { %s227_s21 = sshll.u32 %s381_s9, 7  ;;  %s226_s22 = sshll.u32 %s87_s20, 3 }
  0x10   : > { %s561_s18 = scalar_select %p445_p11, 1, 0 }
  0x11   : > { %s562_s19 = scalar_select %p449_p12, 1, 0 }
  0x12   : > { %s458_s25 = scalar_lea.hbm %s556_s0, %s227_s21  ;;  %s91_s26 = scalar_lea.vmem [#allocation2], %s226_s22 }
  0x13   : > { %s98_s27 = sshll.u32 %s91_s26, 4  ;;  %p462_p13 = pnand %p247_p10, %p434_p5  ;;  %s466_s27 = int_to_ptr.vmem [resolvable:$true] %s98_s27 }
  0x14   : > { %s88_s29 = scalar_lea.sflag [#allocation3], %s87_s20  ;;  %s285_s30 = scalar_lea.hbm %s458_s25, 128 }
  0x15   : > { %p286_p2 = scmp.ne.s32.totalorder %s458_s25, %s285_s30  ;;  %p287_p3 = pneg %p462_p13 }
  0x16   : > { %s290_s4 = scalar_lea.hbm %s556_s0, 256  ;;  %p291_p5 = scmp.lt.u32.totalorder %s458_s25, %s556_s0 }
  0x17   : > { %p288_p4 = pnand %p287_p3, %p286_p2  ;;  %p292_p8 = scmp.lt.u32.totalorder %s290_s4, %s285_s30 }
  0x18   : > { %p294_p9 = scmp.lt.u32.totalorder %s285_s30, %s458_s25 }
  0x19   : > { %p289_p7 = pneg %p288_p4  ;;  %p293_p10 = por %p292_p8, %p291_p5 }
  0x1b   : > { %p295_p0 = por %p294_p9, %p293_p10 }
  0x1d   : > { %p296_p1 = pnand %p295_p0, %p289_p7 }
  0x1f   : > { %299 = shalt.err (!%p296_p1)
}
  0x20   : > { %s300_s13 = scalar_lea.vmem %s466_s27, 128  ;;  %s383_s14 = smov [#allocation2]  }
  0x21   : > { %p301_p2 = scmp.ne.s32.totalorder %s466_s27, %s300_s13  ;;  %s305_s16 = sshll.u32 %s383_s14, 4  ;;  %s306_s16 = int_to_ptr.vmem [resolvable:$false] %s305_s16 }
  0x22   : > { %s307_s20 = scalar_lea.vmem %s306_s16, 256  ;;  %p308_p11 = scmp.lt.s32.totalorder %s466_s27, %s306_s16 }
  0x23   : > { %p303_p4 = pnand %p301_p2, %p287_p3  ;;  %p309_p5 = scmp.lt.s32.totalorder %s307_s20, %s300_s13 }
  0x25   : > { %p304_p12 = pneg %p303_p4  ;;  %p310_p8 = por %p309_p5, %p308_p11 }
  0x27   : > { %p311_p9 = pnand %p310_p8, %p304_p12 }
  0x29   : > { %314 = shalt.err (!%p311_p9)
}
  0x2a   : > { %242 = dma.hbm_to_vmem [thread:$0]  (!%p462_p13), %s458_s25, 128, %s466_s27, %s88_s29  }
  0x2b   : > { %p564_p0 = scmp.lt.s32.totalorder %s381_s9, 3  ;;  %p565_p1 = scmp.ge.s32.totalorder %s381_s9, 1 }
  0x2d   : > { %p104_p3 = pnand %p565_p1, %p564_p0 }
  0x2e   : > { %s500_s21 = sand.u32 (!%p104_p3), 1, %s373_s7  }
  0x2f   : > { %107 = sbr.rel (%p104_p3) target bundleno = 98 (0x62), region = 24  ;;  %s229_s22 = sshll.u32 (!%p104_p3), %s500_s21, 3 }
  0x30   : > { %s110_s23 = scalar_lea.sflag (!%p104_p3), [#allocation3], %s500_s21  ;;  %s113_s24 = scalar_lea.vmem (!%p104_p3), [#allocation2], %s229_s22 }
  0x36   : > { %360 = dma.done.wait (%p438_p6), %s110_s23, 128  }
  0x37   : > { %362 = vsyncadd (%p438_p6), %s110_s23, 4294967168  ;;  %v132_v0 = vld [vmem:[%s113_s24] sm:$0xff]  ;;  %s131_s25 = scalar_lea.vmem [#allocation5], %s229_s22  ;;  %s232_s27 = sshll.u32 %s416_s10, 7 }
  0x38   : > { %v133_v1 = vsub.f32 0.0, %v132_v0  ;;  %s153_s26 = sshll.u32 %s131_s25, 4  ;;  %s514_s17 = scalar_lea.hbm %s557_s1, %s232_s27  ;;  %s509_s26 = int_to_ptr.vmem [resolvable:$true] %s153_s26 }
  0x39   : > { %s140_s30 = scalar_lea.sflag [#allocation4], %s500_s21  ;;  %s315_s2 = scalar_lea.vmem %s509_s26, 128 }
  0x3a   : > { %v134_v2 = vmul.f32 1.442695, %v133_v1  ;;  %p316_p6 = scmp.ne.s32.totalorder %s509_s26, %s315_s2  ;;  %p566_p11 = scmp.ne.s32.totalorder %s561_s18, 0 }
  0x3b   : > { %s384_s3 = smov [#allocation5]  }
  0x3c   : > { %281 = vpow2.f32 %v134_v2  ;;  %p317_p12 = pnand %p316_p6, %p566_p11  ;;  %s319_s10 = sshll.u32 %s384_s3, 4  ;;  %s320_s10 = int_to_ptr.vmem [resolvable:$false] %s319_s10 }
  0x3d   : > { %s321_s4 = scalar_lea.vmem %s320_s10, 256  ;;  %p322_p7 = scmp.lt.s32.totalorder %s509_s26, %s320_s10 }
  0x3e   : > { %p318_p13 = pneg %p317_p12  ;;  %p323_p10 = scmp.lt.s32.totalorder %s321_s4, %s315_s2 }
  0x40   : > { %p324_p2 = por %p323_p10, %p322_p7 }
  0x42   : > { %p325_p4 = pnand %p324_p2, %p318_p13 }
  0x46   : > { %v282_v3 = vpop.eup %281 }
  0x47   : > { %v136_v4 = vadd.f32 1.0, %v282_v3 }
  0x49   : > { %283 = vrcp.f32 %v136_v4 }
  0x53   : > { %v284_v5 = vpop.eup %283 }
  0x54   : > { %138 = vst [vmem:[%s131_s25] sm:$0xff] %v284_v5 }
  0x55   : > { %328 = shalt.err (!%p325_p4)
}
  0x56   : > { %s329_s5 = scalar_lea.hbm %s514_s17, 128  ;;  %s333_s14 = scalar_lea.hbm %s557_s1, 256 }
  0x57   : > { %p330_p5 = scmp.ne.s32.totalorder %s514_s17, %s329_s5  ;;  %p334_p0 = scmp.lt.u32.totalorder %s514_s17, %s557_s1 }
  0x58   : > { %p335_p1 = scmp.lt.u32.totalorder %s333_s14, %s329_s5  ;;  %p337_p6 = scmp.lt.u32.totalorder %s329_s5, %s514_s17 }
  0x59   : > { %p331_p8 = pnand %p330_p5, %p566_p11 }
  0x5a   : > { %p336_p3 = por %p335_p1, %p334_p0 }
  0x5b   : > { %p332_p9 = pneg %p331_p8 }
  0x5c   : > { %p338_p12 = por %p337_p6, %p336_p3 }
  0x5e   : > { %p339_p13 = pnand %p338_p12, %p332_p9 }
  0x60   : > { %342 = shalt.err (!%p339_p13)
}
  0x61   : > { %237 = dma.vmem_to_hbm [thread:$0]  (%p566_p11), %s509_s26, 128, %s514_s17, %s140_s30  }
  0x62 PF: > { %s165_s21 = sand.u32 1, %s369_s6   ;;  %p567_p7 = scmp.ne.s32.totalorder %s562_s19, 0 }
  0x63   : > { %p568_p10 = scmp.ge.s32.totalorder %s381_s9, 2  ;;  %s166_s22 = scalar_lea.sflag [#allocation4], %s165_s21 }
  0x65   : > { %p244_p2 = pnand %p568_p10, %p567_p7 }
  0x67   : > { %364 = dma.done.wait (!%p244_p2), %s166_s22, 128  }
  0x68   : > { %366 = vsyncadd (!%p244_p2), %s166_s22, 4294967168  ;;  %p14_p4 = scmp.ge.s32.totalorder %s420_s12, 4   ;;  %s569_s6 = smov %s373_s7 }
  0x69   : > { %s570_s7 = smov %s377_s8  ;;  %s571_s8 = smov %s432_s15 }
  0x6a   : > { %s572_s9 = smov %s420_s12  ;;  %16 = sbr.rel (!%p14_p4) target bundleno = 5 (0x5), region = 69 }
  0x71   :  { %171 = vsyncpa [#allocation3], 1 }
  0x72   :  { %173 = vsyncpa [#allocation3 + $0x1], 1 }
  0x73   :  { %174 = vsyncpa [#allocation4], 1 }
  0x74   :  { %176 = vsyncpa [#allocation4 + $0x1], 1 }

</bundles_post_ra>
